<compile_context>
chip_gen: v6e
topology: v6e:2x2x1
jax: 0.10.0
libtpu: 0.0.40
codegen_flags: <defaults>
</compile_context>

<pallas_src>
import jax
import jax.numpy as jnp
from jax.experimental import pallas as pl
from jax.experimental.pallas import tpu as pltpu


def mlp_enc_kernel(x_ref, w1_ref, b1_ref, wh_ref, bh_ref, out_ref):
    # Hidden layer: Linear + LeakyReLU (negative_slope = 0.01, PyTorch default).
    x = x_ref[...]
    h = jnp.dot(x, w1_ref[...], preferred_element_type=jnp.float32) + b1_ref[...]
    h = jnp.where(h > 0, h, 0.01 * h)

    # Fused heads: one matmul producing [tile_n, 2Z] = [mu | log_var].
    out_ref[...] = (jnp.dot(h, wh_ref[...], preferred_element_type=jnp.float32)
                    + bh_ref[...]).astype(out_ref.dtype)


def mlp_enc_forward(x, w1, b1, wmu, bmu, wlv, blv, *, tile_n=None):
    """x: [N, in_dim]; w1: [in_dim, hid]; wmu/wlv: [hid, z]; biases: [1, dim].

    Weights are pre-transposed ([in, out]) so the kernel computes x @ W + b on
    the MXU. Returns (mu, log_var), each [N, z].
    """
    N, D = x.shape
    H = w1.shape[1]
    Z = wmu.shape[1]

    # Fuse the two heads into one lane-denser weight / bias / output.
    w_heads = jnp.concatenate([wmu, wlv], axis=1)   # [H, 2Z]
    b_heads = jnp.concatenate([bmu, blv], axis=1)   # [1, 2Z]

    # Batch tiling for software pipelining. 512 f32 rows of D + 2Z lanes
    # double-buffered is well under the 32 MiB scoped-VMEM default (v5e/v6e/v7x).
    if tile_n is None:
        tile_n = 512 if N >= 512 else N
    n_pad = (-N) % tile_n
    if n_pad:
        x = jnp.pad(x, ((0, n_pad), (0, 0)))
    n_padded = N + n_pad
    grid = (n_padded // tile_n,)

    out_shape = jax.ShapeDtypeStruct((n_padded, 2 * Z), jnp.float32)

    tiled = lambda shape: pl.BlockSpec(shape, lambda i: (i, 0))   # follows batch grid
    resident = lambda shape: pl.BlockSpec(shape, lambda i: (0, 0))  # VMEM-resident

    out = pl.pallas_call(
        mlp_enc_kernel,
        out_shape=out_shape,
        grid=grid,
        in_specs=[
            tiled((tile_n, D)),       # x        (pipelined over batch tiles)
            resident((D, H)),         # W1
            resident((1, H)),         # b1
            resident((H, 2 * Z)),     # [Wmu | Wlv]
            resident((1, 2 * Z)),     # [bmu | blv]
        ],
        out_specs=tiled((tile_n, 2 * Z)),
        compiler_params=pltpu.CompilerParams(
            dimension_semantics=("parallel",)),   # megacore-shardable on v7x
    )(x, w1, b1, w_heads, b_heads)

    out = out[:N]
    mu = out[:, :Z]
    log_var = out[:, Z:]
    return mu, log_var


def reference_forward(x, w1, b1, wmu, bmu, wlv, blv):
    h = x @ w1 + b1
    h = jnp.where(h > 0, h, 0.01 * h)
    return h @ wmu + bmu, h @ wlv + blv


if __name__ == "__main__":
    # Small shapes consistent with the module: in_dim=32 -> hidden=16, z_dim=8
    N, IN_DIM, Z_DIM = 8, 32, 8
    HID = IN_DIM // 2

    key = jax.random.PRNGKey(0)
    kx, k1, k2, k3, k4, k5, k6 = jax.random.split(key, 7)

    x = jax.random.normal(kx, (N, IN_DIM), dtype=jnp.float32)

    # Deterministic parameter init (weights stored pre-transposed: [in, out])
    w1 = jax.random.normal(k1, (IN_DIM, HID), dtype=jnp.float32) * 0.1
    b1 = jax.random.normal(k2, (1, HID), dtype=jnp.float32) * 0.01
    wmu = jax.random.normal(k3, (HID, Z_DIM), dtype=jnp.float32) * 0.1
    bmu = jax.random.normal(k4, (1, Z_DIM), dtype=jnp.float32) * 0.01
    wlv = jax.random.normal(k5, (HID, Z_DIM), dtype=jnp.float32) * 0.1
    blv = jax.random.normal(k6, (1, Z_DIM), dtype=jnp.float32) * 0.01

    mu, log_var = mlp_enc_forward(x, w1, b1, wmu, bmu, wlv, blv)
    jax.block_until_ready((mu, log_var))

    mu_ref, lv_ref = reference_forward(x, w1, b1, wmu, bmu, wlv, blv)
    assert jnp.allclose(mu, mu_ref, atol=1e-5, rtol=1e-5)
    assert jnp.allclose(log_var, lv_ref, atol=1e-5, rtol=1e-5)

    print("KERNEL_OK")
</pallas_src>

<mosaic_0001>
module attributes {stable_mosaic.version = 11 : i64} {
  func.func @mlp_enc_kernel(%arg0: i32, %arg1: memref<8x32xf32, #tpu.memory_space<vmem>>, %arg2: memref<32x16xf32, #tpu.memory_space<vmem>>, %arg3: memref<1x16xf32, #tpu.memory_space<vmem>>, %arg4: memref<16x16xf32, #tpu.memory_space<vmem>>, %arg5: memref<1x16xf32, #tpu.memory_space<vmem>>, %arg6: memref<8x16xf32, #tpu.memory_space<vmem>>) attributes {dimension_semantics = [#tpu.dimension_semantics<parallel>], iteration_bounds = array<i64: 1>, scalar_prefetch = 0 : i64, scratch_operands = 0 : i64, tpu.core_type = #tpu.core_type<tc>, window_params = [{transform_indices = @transform_0, window_bounds = array<i64: 8, 32>}, {pipeline_mode = #tpu.pipeline_mode<synchronous>, transform_indices = @transform_1, window_bounds = array<i64: 32, 16>}, {pipeline_mode = #tpu.pipeline_mode<synchronous>, transform_indices = @transform_2, window_bounds = array<i64: 1, 16>}, {pipeline_mode = #tpu.pipeline_mode<synchronous>, transform_indices = @transform_3, window_bounds = array<i64: 16, 16>}, {pipeline_mode = #tpu.pipeline_mode<synchronous>, transform_indices = @transform_4, window_bounds = array<i64: 1, 16>}, {transform_indices = @transform_5, window_bounds = array<i64: 8, 16>}]} {
    %c0 = arith.constant 0 : index
    %c0_0 = arith.constant 0 : index
    %0 = vector.load %arg1[%c0, %c0_0] : memref<8x32xf32, #tpu.memory_space<vmem>>, vector<8x32xf32>
    %c0_1 = arith.constant 0 : index
    %c0_2 = arith.constant 0 : index
    %1 = vector.load %arg2[%c0_1, %c0_2] : memref<32x16xf32, #tpu.memory_space<vmem>>, vector<32x16xf32>
    %cst = arith.constant dense<0.000000e+00> : vector<8x16xf32>
    %2 = tpu.matmul %0, %1, %cst {dimension_numbers = #tpu.dot_dimension_numbers<[1], [0], [0], [1], [0, 0, 1, 1], [], []>} : vector<8x32xf32>, vector<32x16xf32>, vector<8x16xf32> -> vector<8x16xf32>
    %c0_3 = arith.constant 0 : index
    %c0_4 = arith.constant 0 : index
    %3 = vector.load %arg3[%c0_3, %c0_4] : memref<1x16xf32, #tpu.memory_space<vmem>>, vector<1x16xf32>
    %4 = vector.broadcast %3 : vector<1x16xf32> to vector<8x16xf32>
    %5 = arith.addf %2, %4 : vector<8x16xf32>
    %cst_5 = arith.constant 0.000000e+00 : f32
    %6 = vector.broadcast %cst_5 : f32 to vector<8x16xf32>
    %7 = arith.cmpf ogt, %5, %6 : vector<8x16xf32>
    %cst_6 = arith.constant 0.00999999977 : f32
    %8 = vector.broadcast %cst_6 : f32 to vector<8x16xf32>
    %9 = arith.mulf %8, %5 : vector<8x16xf32>
    %10 = arith.select %7, %5, %9 : vector<8x16xi1>, vector<8x16xf32>
    %c0_7 = arith.constant 0 : index
    %c0_8 = arith.constant 0 : index
    %11 = vector.load %arg4[%c0_7, %c0_8] : memref<16x16xf32, #tpu.memory_space<vmem>>, vector<16x16xf32>
    %cst_9 = arith.constant dense<0.000000e+00> : vector<8x16xf32>
    %12 = tpu.matmul %10, %11, %cst_9 {dimension_numbers = #tpu.dot_dimension_numbers<[1], [0], [0], [1], [0, 0, 1, 1], [], []>} : vector<8x16xf32>, vector<16x16xf32>, vector<8x16xf32> -> vector<8x16xf32>
    %c0_10 = arith.constant 0 : index
    %c0_11 = arith.constant 0 : index
    %13 = vector.load %arg5[%c0_10, %c0_11] : memref<1x16xf32, #tpu.memory_space<vmem>>, vector<1x16xf32>
    %14 = vector.broadcast %13 : vector<1x16xf32> to vector<8x16xf32>
    %15 = arith.addf %12, %14 : vector<8x16xf32>
    %c0_12 = arith.constant 0 : index
    %c0_13 = arith.constant 0 : index
    %16 = vector.load %arg6[%c0_12, %c0_13] : memref<8x16xf32, #tpu.memory_space<vmem>>, vector<8x16xf32>
    tpu.vector_store %arg6[%c0_12, %c0_13], %15 {strides = array<i32>} : memref<8x16xf32, #tpu.memory_space<vmem>>, vector<8x16xf32>,
    return
  }
  func.func @transform_0(%arg0: i32) -> (i32, i32) {
    %c0_i32 = arith.constant 0 : i32
    %c0_i32_0 = arith.constant 0 : i32
    return %arg0, %c0_i32 : i32, i32
  }
  func.func @transform_1(%arg0: i32) -> (i32, i32) {
    %c0_i32 = arith.constant 0 : i32
    %c0_i32_0 = arith.constant 0 : i32
    %c0_i32_1 = arith.constant 0 : i32
    return %c0_i32, %c0_i32_0 : i32, i32
  }
  func.func @transform_2(%arg0: i32) -> (i32, i32) {
    %c0_i32 = arith.constant 0 : i32
    %c0_i32_0 = arith.constant 0 : i32
    %c0_i32_1 = arith.constant 0 : i32
    return %c0_i32, %c0_i32_0 : i32, i32
  }
  func.func @transform_3(%arg0: i32) -> (i32, i32) {
    %c0_i32 = arith.constant 0 : i32
    %c0_i32_0 = arith.constant 0 : i32
    %c0_i32_1 = arith.constant 0 : i32
    return %c0_i32, %c0_i32_0 : i32, i32
  }
  func.func @transform_4(%arg0: i32) -> (i32, i32) {
    %c0_i32 = arith.constant 0 : i32
    %c0_i32_0 = arith.constant 0 : i32
    %c0_i32_1 = arith.constant 0 : i32
    return %c0_i32, %c0_i32_0 : i32, i32
  }
  func.func @transform_5(%arg0: i32) -> (i32, i32) {
    %c0_i32 = arith.constant 0 : i32
    %c0_i32_0 = arith.constant 0 : i32
    return %arg0, %c0_i32 : i32, i32
  }
}

</mosaic_0001>

<bundles_post_ra>
// kernel: tpu_custom_call.1
= control target key start
LH: loop header
LB: loop body
LE: loop exit
PB: predicated region body
PF: predicated region fallthrough
CT: control target
= control target key end

     0   :  { %v263_v1 = vmov 0.0   ;;  %vm264_vm0 = vmmov 0   ;;  %s326_s0 = inlined_call_operand.vmem [shape: f32[8,32], index: 0, kind: input, shape index: {}]   ;;  %s327_s1 = inlined_call_operand.vmem [shape: f32[32,16], index: 1, kind: input, shape index: {}]   ;;  %s328_s2 = inlined_call_operand.vmem [shape: f32[1,16], index: 2, kind: input, shape index: {}]   ;;  %s329_s3 = inlined_call_operand.vmem [shape: f32[16,16], index: 3, kind: input, shape index: {}]   ;;  %s330_s4 = inlined_call_operand.vmem [shape: f32[1,16], index: 4, kind: input, shape index: {}]   ;;  %s331_s5 = inlined_call_operand.hbm [shape: f32[8,16], index: 5, kind: output, shape index: {}]  }
   0x1   :  { %v25_v0 = vld [vmem:[%s327_s1 + $0x18] sm:$0xff]  ;;  %220 = vmatprep.subr.mxu0 %v263_v1  ;;  %v24_v2 = vld [vmem:[%s327_s1 + $0x10] sm:$0xff]  ;;  %228 = vmatprep.mubr.msk.f32.mxu0 %vm264_vm0, %v263_v1 }
   0x2   :  { %221 = vmatpush3.msra.mxu0 %v25_v0  ;;  %231 = vmatprep.subr.mxu1 %v263_v1 }
   0x3   :  { %10 = vsyncpa [#allocation3], 0  ;;  %222 = vmatprep.subr.mxu0 %v263_v1  ;;  %v23_v3 = vld [vmem:[%s327_s1 + $0x8] sm:$0xff]  ;;  %235 = vmatprep.mubr.msk.f32.mxu1 %vm264_vm0, %v263_v1  ;;  %v22_v4 = vld [vmem:[%s327_s1] sm:$0xff]  ;;  %vm33_vm1 = vcmask 261120   ;;  %vm119_vm3 = vcmask 130048  }
   0x4   :  { %223 = vmatpush3.msra.mxu0 %v24_v2  ;;  %v21_v5 = vld [vmem:[%s326_s0] sm:$0xff]  ;;  %v111_v6 = vld [vmem:[%s329_s3 + $0x8] sm:$0xff]  ;;  %s265_s9 = smov [#allocation2]  }
   0x5   :  { %224 = vmatprep.subr.mxu0 %v263_v1  ;;  %232 = vmatpush3.msra.mxu1 %v111_v6  ;;  %v110_v7 = vld [vmem:[%s329_s3] sm:$0xff]  ;;  %s200_s3 = sshll.u32 %s265_s9, 4  ;;  %s201_s3 = int_to_ptr.vmem [resolvable:$true] %s200_s3 }
   0x6   :  { %225 = vmatpush3.msra.mxu0 %v23_v3  ;;  %233 = vmatprep.subr.mxu1 %v263_v1  ;;  %v208_v8 = vld [vmem:[%s328_s2] ss:$0 sm:$0xff]  ;;  %s241_s2 = scalar_lea.vmem %s201_s3, 128  ;;  %p246_p1 = scmp.lt.s32.totalorder %s201_s3, %s201_s3 }
   0x7   :  { %226 = vmatprep.subr.mxu0 %v263_v1  ;;  %234 = vmatpush3.msra.mxu1 %v110_v7  ;;  %v210_v14 = vld [vmem:[%s330_s4] ss:$0 sm:$0xff]  ;;  %p242_p0 = scmp.ne.s32.totalorder %s201_s3, %s241_s2  ;;  %p247_p2 = scmp.lt.s32.totalorder %s241_s2, %s241_s2 }
   0x8   :  { %227 = vmatpush3.msra.mxu0 %v22_v4 }
   0x9   :  { %229 = vmatmul.mubr.msk.f32.vlgmr.msra.gmra.mxu0 %vm33_vm1, %v21_v5  ;;  %p248_p3 = por %p247_p2, %p246_p1 }
   0xb   :  { %p249_p4 = pnand %p248_p3, %p242_p0 }
  0xc9   :  { %v103_v9 = vpop.f32.mrf.mxu0 }
  0xca   :  { %v104_v10 = vadd.f32 %v208_v8, %v103_v9 }
  0xcb   :  { %v230_v11 = vpop.f32.mrf.mxu0 }
  0xcc   :  { %vm107_vm2 = vcmp.gt.f32.partialorder %v104_v10, 0.0  ;;  %v108_v12 = vmul.f32 0.01, %v104_v10 }
  0xce   :  { %v109_v13 = vsel %vm107_vm2, %v104_v10, %v108_v12 }
  0xcf   :  { %236 = vmatmul.mubr.msk.f32.vlgmr.msra.gmra.mxu1 %vm119_vm3, %v109_v13 }
 0x18f   :  { %v189_v15 = vpop.f32.mrf.mxu1 }
 0x190   :  { %v190_v16 = vadd.f32 %v210_v14, %v189_v15 }
 0x191   :  { %v237_v17 = vpop.f32.mrf.mxu1 }
 0x192   :  { %193 = vst.msk [vmem:[#allocation2] sm:$0xff] %vm119_vm3, %v190_v16 }
 0x193   :  { %252 = shalt.err (!%p249_p4)
}
 0x194   :  { %203 = dma.vmem_to_hbm [thread:$0]  %s201_s3, 128, %s331_s5, [#allocation3]  }
 0x195   :  { %261 = dma.done.wait [#allocation3], 128  }
 0x196   :  { %262 = vsyncadd [#allocation3], 4294967168 }
 0x197   :  { %207 = vsyncpa [#allocation3], 1 }

</bundles_post_ra>
